<compile_context>
chip_gen: v6e
topology: v6e:2x2x1
jax: 0.10.0
libtpu: 0.0.40
codegen_flags: <defaults>
</compile_context>

<pallas_src>
import math

import jax
import jax.numpy as jnp
from jax import lax
from jax.experimental import pallas as pl
from jax.experimental.pallas import tpu as pltpu
import numpy as np

RADIUS = 5
_R2 = float(RADIUS * RADIUS)                    # squared Chebyshev window bound
_KMIN = math.exp(-1.0)                          # min of the 11x11 Gaussian table
_SCALE_A = 1.0 / (1.0 - _KMIN)
_SCALE_B = -_KMIN / (1.0 - _KMIN)               # g*A + B == (g - kmin)/(1 - kmin)
_NEG_INV_2R2 = -1.0 / (2.0 * RADIUS * RADIUS)


def _make_kernel(tn, h, w):
    """Kernel over one (tn, h, w) output block; centers live whole in SMEM."""

    def kernel(cx_ref, cy_ref, out_ref):
        # cx_ref / cy_ref: SMEM (n_pad,) f32 — rounded & clamped centers.
        # out_ref:         VMEM (tn, h, w) output block.
        base = pl.program_id(0) * tn

        # Pixel-index vectors in the layouts they are consumed in
        # (hoisted out of the per-row loop — computed once per grid step).
        y_idx = lax.broadcasted_iota(jnp.int32, (h, 1), 0).astype(jnp.float32)
        x_idx = lax.broadcasted_iota(jnp.int32, (1, w), 1).astype(jnp.float32)

        @pl.loop(0, tn)
        def _(t):
            i = base + t
            cy = cy_ref[i]                      # scalar SMEM reads
            cx = cx_ref[i]
            dy = y_idx - cy                     # (h, 1)
            dx = x_idx - cx                     # (1, w)
            dy2 = dy * dy
            dx2 = dx * dx
            # Separable masked / prescaled factors: O(h + w) work, exp on EUP.
            fy = jnp.where(dy2 <= _R2,
                           jnp.exp(dy2 * _NEG_INV_2R2) * _SCALE_A, 0.0)
            fx = jnp.where(dx2 <= _R2,
                           jnp.exp(dx2 * _NEG_INV_2R2), 0.0)
            # Per-pixel work: one broadcast fma + one max.  Outside the 11x11
            # window fy*fx == 0 -> val == B < 0 -> clamped to exactly 0.
            val = fy * fx + _SCALE_B            # (h, w)
            out_ref[t] = jnp.maximum(val, 0.0).astype(out_ref.dtype)
            # TODO(synk): integer heatmap dtypes truncate toward zero here;
            # only float dtypes match PyTorch assignment semantics exactly.

    return kernel


def to_heatmap(points, img, radius=RADIUS, block_batch=None):
    """points: (N, 2) float (cx, cy); img: (N, C, H, W). Returns (N, H, W)."""
    assert radius == RADIUS
    n, _, h, w = img.shape
    out_dtype = img.dtype
    itemsize = jnp.dtype(out_dtype).itemsize

    # Glue: round (half-to-even, matches torch.round) + clamp, kept in f32
    # (values are exact small integers, so in-kernel math is exact).
    pts_r = jnp.round(points.astype(jnp.float32))
    cx = jnp.clip(pts_r[:, 0], 0.0, float(w - 1))
    cy = jnp.clip(pts_r[:, 1], 0.0, float(h - 1))

    # ---- batch-block sizing -------------------------------------------------
    row_bytes = h * w * itemsize
    budget = 8 * 1024 * 1024                    # per output block (~8 MiB)
    if block_batch is None:
        tn = max(1, budget // row_bytes)
    else:
        tn = max(1, int(block_batch))
    tn = min(tn, n)
    if n >= 2:
        # >= 2 grid steps so the "parallel" batch axis can shard across v7x's
        # two TensorCores (no effect on v5e/v6e).
        tn = min(tn, pl.cdiv(n, 2))
    n_pad = pl.cdiv(n, tn) * tn
    if n_pad != n:                              # padded rows are sliced off below
        pad = n_pad - n
        cx = jnp.pad(cx, (0, pad))
        cy = jnp.pad(cy, (0, pad))

    block_bytes = tn * row_bytes
    # Double-buffered output block + slack; >= 32 MiB so v5e's 16 MiB scoped
    # default is raised, and still inside v7x's 32 MiB scoped / 64 MiB physical.
    vmem_limit = int(max(32 * 1024 * 1024, 2 * block_bytes + (4 << 20)))

    grid = (n_pad // tn,)
    cost = pl.CostEstimate(
        flops=4 * n_pad * h * w,                # fma + max per pixel (+ bcasts)
        transcendentals=n_pad * (h + w),        # separable exp only
        bytes_accessed=n_pad * h * w * itemsize + 2 * n_pad * 4,
    )

    out = pl.pallas_call(
        _make_kernel(tn, h, w),
        out_shape=jax.ShapeDtypeStruct((n_pad, h, w), out_dtype),
        grid=grid,
        in_specs=[
            pl.BlockSpec(memory_space=pltpu.MemorySpace.SMEM),   # cx (whole)
            pl.BlockSpec(memory_space=pltpu.MemorySpace.SMEM),   # cy (whole)
        ],
        out_specs=pl.BlockSpec((tn, h, w), lambda b: (b, 0, 0)),
        compiler_params=pltpu.CompilerParams(
            dimension_semantics=("parallel",),
            vmem_limit_bytes=vmem_limit,
        ),
        cost_estimate=cost,
    )(cx, cy)

    if n_pad != n:
        out = out[:n]
    return out                                   # already (N, H, W): no relayout


def _reference_numpy(points, img, radius=RADIUS):
    """Direct NumPy port of the PyTorch forward, for verification."""
    n, _, h, w = img.shape
    bounds = np.arange(-radius, radius + 1, 1.0, dtype=np.float32)
    y, x = np.meshgrid(bounds, bounds, indexing="ij")
    kernel = np.exp(-(x ** 2 + y ** 2) / (2 * radius ** 2)).astype(np.float32)
    kernel = (kernel - kernel.min()) / (kernel.max() - kernel.min())

    heatmap = np.zeros((n, h, w), dtype=np.asarray(img).dtype)
    pts = np.asarray(points)
    for i in range(n):
        cxi, cyi = np.rint(pts[i]).astype(np.int64)
        cxi = int(np.clip(cxi, 0, w - 1))
        cyi = int(np.clip(cyi, 0, h - 1))
        left = min(cxi, radius)
        right = min(w - 1 - cxi, radius)
        bot = min(cyi, radius)
        top = min(h - 1 - cyi, radius)
        heatmap[i, cyi - bot:cyi + top + 1, cxi - left:cxi + right + 1] = \
            kernel[radius - bot:radius + top + 1,
                   radius - left:radius + right + 1]
    return heatmap


if __name__ == "__main__":
    key = jax.random.PRNGKey(0)
    k_img, k_pts = jax.random.split(key)

    # Primary check: small shapes consistent with the module; includes a
    # near-edge point so the border-cropping path is exercised.
    N, C, H, W = 2, 4, 16, 16
    img = jax.random.normal(k_img, (N, C, H, W), dtype=jnp.float32)
    points = jnp.array([[3.4, 12.6],
                        [14.8, 1.2]], dtype=jnp.float32)

    out = jax.block_until_ready(to_heatmap(points, img))
    ref = _reference_numpy(np.asarray(points), np.asarray(img))
    assert out.shape == (N, H, W) and out.dtype == img.dtype
    np.testing.assert_allclose(np.asarray(out), ref, rtol=1e-5, atol=1e-5)

    # Secondary check: multi-row blocks, in-kernel batch loop, batch padding,
    # and a multi-step "parallel" grid (N=11, TN=4 -> N_pad=12, grid=3).
    N2 = 11
    img2 = jax.random.normal(k_img, (N2, C, H, W), dtype=jnp.float32)
    pts2 = jax.random.uniform(k_pts, (N2, 2), minval=-2.0, maxval=18.0,
                              dtype=jnp.float32)
    out2 = jax.block_until_ready(to_heatmap(pts2, img2, block_batch=4))
    ref2 = _reference_numpy(np.asarray(pts2), np.asarray(img2))
    assert out2.shape == (N2, H, W) and out2.dtype == img2.dtype
    np.testing.assert_allclose(np.asarray(out2), ref2, rtol=1e-5, atol=1e-5)

    print("KERNEL_OK")
</pallas_src>

<mosaic_0001>
module attributes {stable_mosaic.version = 11 : i64} {
  func.func @kernel(%arg0: i32, %arg1: memref<2xf32, #tpu.memory_space<smem>>, %arg2: memref<2xf32, #tpu.memory_space<smem>>, %arg3: memref<1x16x16xf32, #tpu.memory_space<vmem>>) attributes {dimension_semantics = [#tpu.dimension_semantics<parallel>], iteration_bounds = array<i64: 2>, scalar_prefetch = 0 : i64, scratch_operands = 0 : i64, tpu.core_type = #tpu.core_type<tc>, window_params = [{transform_indices = @transform_0, window_bounds = array<i64: 2>}, {transform_indices = @transform_1, window_bounds = array<i64: 2>}, {transform_indices = @transform_2, window_bounds = array<i64: 1, 16, 16>}]} {
    %c1_i32 = arith.constant 1 : i32
    %0 = arith.muli %arg0, %c1_i32 : i32
    %1 = tpu.iota {dimensions = array<i32: 0>} : vector<16x1xi32>
    %2 = arith.sitofp %1 : vector<16x1xi32> to vector<16x1xf32>
    %3 = tpu.iota {dimensions = array<i32: 1>} : vector<1x16xi32>
    %4 = arith.sitofp %3 : vector<1x16xi32> to vector<1x16xf32>
    %c0_i32 = arith.constant 0 : i32
    %c1_i32_0 = arith.constant 1 : i32
    %5 = arith.muli %c0_i32, %c1_i32_0 : i32
    %c0_i32_1 = arith.constant 0 : i32
    %6 = arith.addi %c0_i32_1, %5 : i32
    %7 = arith.addi %0, %6 : i32
    %8 = arith.index_cast %7 : i32 to index
    %9 = memref.load %arg2[%8] : memref<2xf32, #tpu.memory_space<smem>>
    %10 = arith.index_cast %7 : i32 to index
    %11 = memref.load %arg1[%10] : memref<2xf32, #tpu.memory_space<smem>>
    %12 = vector.broadcast %9 : f32 to vector<16x1xf32>
    %13 = arith.subf %2, %12 : vector<16x1xf32>
    %14 = vector.broadcast %11 : f32 to vector<1x16xf32>
    %15 = arith.subf %4, %14 : vector<1x16xf32>
    %16 = arith.mulf %13, %13 : vector<16x1xf32>
    %17 = arith.mulf %15, %15 : vector<1x16xf32>
    %cst = arith.constant 2.500000e+01 : f32
    %18 = vector.broadcast %cst : f32 to vector<16x1xf32>
    %19 = arith.cmpf ole, %16, %18 : vector<16x1xf32>
    %cst_2 = arith.constant -2.000000e-02 : f32
    %20 = vector.broadcast %cst_2 : f32 to vector<16x1xf32>
    %21 = arith.mulf %16, %20 : vector<16x1xf32>
    %22 = math.exp %21 : vector<16x1xf32>
    %cst_3 = arith.constant 1.58197665 : f32
    %23 = vector.broadcast %cst_3 : f32 to vector<16x1xf32>
    %24 = arith.mulf %22, %23 : vector<16x1xf32>
    %cst_4 = arith.constant 0.000000e+00 : f32
    %25 = vector.broadcast %cst_4 : f32 to vector<16x1xf32>
    %26 = arith.select %19, %24, %25 : vector<16x1xi1>, vector<16x1xf32>
    %cst_5 = arith.constant 2.500000e+01 : f32
    %27 = vector.broadcast %cst_5 : f32 to vector<1x16xf32>
    %28 = arith.cmpf ole, %17, %27 : vector<1x16xf32>
    %cst_6 = arith.constant -2.000000e-02 : f32
    %29 = vector.broadcast %cst_6 : f32 to vector<1x16xf32>
    %30 = arith.mulf %17, %29 : vector<1x16xf32>
    %31 = math.exp %30 : vector<1x16xf32>
    %cst_7 = arith.constant 0.000000e+00 : f32
    %32 = vector.broadcast %cst_7 : f32 to vector<1x16xf32>
    %33 = arith.select %28, %31, %32 : vector<1x16xi1>, vector<1x16xf32>
    %34 = vector.broadcast %26 : vector<16x1xf32> to vector<16x16xf32>
    %35 = vector.broadcast %33 : vector<1x16xf32> to vector<16x16xf32>
    %36 = arith.mulf %34, %35 : vector<16x16xf32>
    %cst_8 = arith.constant -0.581976712 : f32
    %37 = vector.broadcast %cst_8 : f32 to vector<16x16xf32>
    %38 = arith.addf %36, %37 : vector<16x16xf32>
    %cst_9 = arith.constant 0.000000e+00 : f32
    %39 = vector.broadcast %cst_9 : f32 to vector<16x16xf32>
    %40 = arith.maximumf %38, %39 : vector<16x16xf32>
    %41 = arith.index_cast %6 : i32 to index
    %c0 = arith.constant 0 : index
    %c0_10 = arith.constant 0 : index
    %42 = vector.load %arg3[%41, %c0, %c0_10] : memref<1x16x16xf32, #tpu.memory_space<vmem>>, vector<1x16x16xf32>
    %43 = vector.shape_cast %42 : vector<1x16x16xf32> to vector<16x16xf32>
    %44 = vector.shape_cast %40 : vector<16x16xf32> to vector<1x16x16xf32>
    tpu.vector_store %arg3[%41, %c0, %c0_10], %44 {strides = array<i32>} : memref<1x16x16xf32, #tpu.memory_space<vmem>>, vector<1x16x16xf32>,
    %c1_i32_11 = arith.constant 1 : i32
    return
  }
  func.func @transform_0(%arg0: i32) -> i32 {
    %c0_i32 = arith.constant 0 : i32
    %c0_i32_0 = arith.constant 0 : i32
    return %c0_i32 : i32
  }
  func.func @transform_1(%arg0: i32) -> i32 {
    %c0_i32 = arith.constant 0 : i32
    %c0_i32_0 = arith.constant 0 : i32
    return %c0_i32 : i32
  }
  func.func @transform_2(%arg0: i32) -> (i32, i32, i32) {
    %c0_i32 = arith.constant 0 : i32
    %c0_i32_0 = arith.constant 0 : i32
    %c0_i32_1 = arith.constant 0 : i32
    return %arg0, %c0_i32, %c0_i32_0 : i32, i32, i32
  }
}

</mosaic_0001>

<bundles_post_ra>
// kernel: tpu_custom_call.1
= control target key start
LH: loop header
LB: loop body
LE: loop exit
PB: predicated region body
PF: predicated region fallthrough
CT: control target
= control target key end

     0   :  { %7 = vsyncpa [#allocation4], 0  ;;  %s611_s0 = inlined_call_operand.hbm [shape: f32[2], index: 0, kind: input, shape index: {}]   ;;  %s612_s1 = inlined_call_operand.vmem [shape: f32[2], index: 1, kind: input, shape index: {}]   ;;  %s613_s2 = inlined_call_operand.hbm [shape: f32[2,16,16], index: 2, kind: output, shape index: {}]  }
   0x1   :  { %8 = vsyncpa [#allocation5], 0 }
   0x2   :  { %9 = vsyncpa [#allocation3], 0 }
   0x3   :  { %11 = vsyncpa [#allocation3 + $0x1], 0  ;;  %s477_s9 = smov 0   ;;  %s479_s10 = smov 0  }
   0x4   :  { %s481_s11 = smov 0   ;;  %s483_s12 = smov 0  }
   0x5 LB: > { %s498_s13 = sadd.s32 4294967295, %s455_s12   ;;  %s279_s14 = sadd.s32 4294967294, %s455_s12   ;;  %s455_s12 = sphi %s483_s12, %s621_s12   ;;  %s451_s11 = sphi %s481_s11, %s620_s11   ;;  %s447_s10 = sphi %s479_s10, %s619_s10   ;;  %s443_s9 = sphi %s477_s9, %s618_s9  }
   0x6   : > { %s502_s15 = sadd.s32 1, %s455_s12   ;;  %s66_s16 = sadd.s32 1, %s451_s11 }
   0x7   : > { %s63_s17 = ssub.s32 %s455_s12, %s502_s15  ;;  %p76_p0 = scmp.ne.s32.totalorder %s451_s11, %s447_s10 }
   0x8   : > { %p64_p1 = scmp.eq.s32.totalorder %s63_s17, 0  ;;  %p77_p2 = scmp.eq.s32.totalorder %s498_s13, 1 }
   0x9   : > { %p82_p3 = scmp.ne.s32.totalorder %s447_s10, %s443_s9  ;;  %p83_p4 = scmp.eq.s32.totalorder %s279_s14, 1 }
   0xa   : > { %s513_s18 = scalar_select %p64_p1, %s451_s11, %s66_s16  }
   0xb   : > { %p515_p5 = por %p77_p2, %p76_p0  ;;  %p519_p6 = por %p83_p4, %p82_p3 }
   0xc   : > { %p280_p7 = scmp.ge.s32.totalorder %s455_s12, 1  ;;  %p90_p8 = scmp.lt.s32.totalorder %s455_s12, 3 }
   0xd   : > { %p314_p10 = scmp.eq.s32.totalorder %s498_s13, 0  ;;  %s112_s24 = sshll.u32 %s612_s1, 4  ;;  %s113_s24 = int_to_ptr.vmem [resolvable:$true] %s112_s24 }
   0xe   : > { %p525_p9 = pnand %p280_p7, %p90_p8  ;;  %s457_s26 = smov [#allocation2]  }
   0xf   : > { %s372_s29 = scalar_lea.vmem %s113_s24, 16  ;;  %p380_p3 = scmp.lt.s32.totalorder %s113_s24, %s113_s24 }
  0x10   : > { %p303_p11 = pneg %p525_p9  ;;  %p373_p13 = scmp.ne.s32.totalorder %s113_s24, %s372_s29 }
  0x11   : > { %p381_p4 = scmp.lt.s32.totalorder %s372_s29, %s372_s29 }
  0x12   : > { %p537_p12 = pnand %p314_p10, %p303_p11 }
  0x13   : > { %p382_p7 = por %p381_p4, %p380_p3 }
  0x14   : > { %306 = dma.hbm_to_smem (!%p537_p12), %s611_s0, 16, %s457_s26, [#allocation4]  }
  0x15   : > { %p374_p0 = pneg %p537_p12 }
  0x17   : > { %p375_p1 = pnand %p374_p0, %p373_p13 }
  0x19   : > { %p376_p2 = pneg %p375_p1 }
  0x1b   : > { %p383_p8 = pnand %p382_p7, %p376_p2 }
  0x1d   : > { %386 = shalt.err (!%p383_p8)
}
  0x1e   : > { %s458_s30 = smov [#allocation6]   ;;  %125 = sbr.rel (%p525_p9) target bundleno = 94 (0x5e), region = 28 }
  0x1f   : > { %309 = dma.vmem_to_smem (!%p537_p12), %s113_s24, 16, %s458_s30, [#allocation5]  }
  0x23   : > { %430 = dma.done.wait (%p314_p10), [#allocation4], 16  }
  0x24   : > { %432 = vsyncadd (%p314_p10), [#allocation4], 4294967280 }
  0x25   : > { %434 = dma.done.wait (%p314_p10), [#allocation5], 16  }
  0x26   : > { %436 = vsyncadd (%p314_p10), [#allocation5], 4294967280 }
  0x27   : > { %135 = sfence }
  0x28   : > { %v147_v0 = vlaneseq  ;;  %s155_s3 = sld [smem:[#allocation6 + %s498_s13]]  ;;  %s144_s5 = sand.u32 1, %s447_s10   ;;  %vm188_vm3 = vcmask 130048  }
  0x29   : > { %s156_s4 = sld [smem:[#allocation2 + %s498_s13]]  ;;  %s286_s6 = sshll.u32 %s144_s5, 4 }
  0x2a   : > { %v148_v1 = vshrl.u32 %v147_v0, 7  ;;  %v153_v2 = vand.u32 127, %v147_v0  ;;  %s146_s7 = scalar_lea.vmem [#allocation7], %s286_s6  ;;  %s292_s14 = sshll.u32 %s498_s13, 8 }
  0x2b   : > { %s205_s8 = sshll.u32 %s146_s7, 4  ;;  %s569_s21 = scalar_lea.hbm %s613_s2, %s292_s14  ;;  %s564_s8 = int_to_ptr.vmem [resolvable:$true] %s205_s8 }
  0x2c   : > { %v150_v3 = vcvt.s32.f32 %v148_v1  ;;  %v154_v4 = vcvt.s32.f32 %v153_v2  ;;  %v149_v5 = vadd.s32 8, %v148_v1  ;;  %s571_s22 = scalar_lea.sflag [#allocation3], %s144_s5  ;;  %s387_s23 = scalar_lea.vmem %s564_s8, 256 }
  0x2d   : > { %p388_p9 = scmp.ne.s32.totalorder %s564_s8, %s387_s23  ;;  %s459_s13 = smov [#allocation7]  }
  0x2e   : > { %v157_v6 = vstv %s155_s3  ;;  %v151_v7 = vcvt.s32.f32 %v149_v5  ;;  %s391_s24 = sshll.u32 %s459_s13, 4  ;;  %s392_s24 = int_to_ptr.vmem [resolvable:$false] %s391_s24 }
  0x2f   : > { %v158_v8 = vsub.f32 %v150_v3, %v157_v6  ;;  %v160_v9 = vstv %s156_s4  ;;  %p389_p10 = pnand %p388_p9, %p515_p5  ;;  %s393_s25 = scalar_lea.vmem %s392_s24, 512 }
  0x30   : > { %v161_v10 = vsub.f32 %v154_v4, %v160_v9  ;;  %v159_v11 = vsub.f32 %v151_v7, %v157_v6  ;;  %p394_p12 = scmp.lt.s32.totalorder %s564_s8, %s392_s24  ;;  %p395_p13 = scmp.lt.s32.totalorder %s393_s25, %s387_s23 }
  0x31   : > { %v162_v12 = vmul.f32 %v158_v8, %v158_v8  ;;  %p390_p11 = pneg %p389_p10 }
  0x32   : > { %v164_v13 = vmul.f32 %v161_v10, %v161_v10  ;;  %v163_v14 = vmul.f32 %v159_v11, %v159_v11  ;;  %p396_p0 = por %p395_p13, %p394_p12 }
  0x33   : > { %v167_v15 = vmul.f32 -0.02, %v162_v12  ;;  %vm165_vm1 = vcmp.le.f32.partialorder %v162_v12, 25.0 }
  0x34   : > { %v178_v16 = vmul.f32 -0.02, %v164_v13  ;;  %v168_v17 = vmul.f32 -0.02, %v163_v14  ;;  %vm177_vm0 = vcmp.le.f32.partialorder %v164_v13, 25.0  ;;  %vm166_vm2 = vcmp.le.f32.partialorder %v163_v14, 25.0  ;;  %p397_p1 = pnand %p396_p0, %p390_p11 }
  0x35   : > { %v169_v18 = vmul.f32 1.442695, %v167_v15 }
  0x36   : > { %v179_v19 = vmul.f32 1.442695, %v178_v16  ;;  %v171_v20 = vmul.f32 1.442695, %v168_v17 }
  0x37   : > { %355 = vpow2.f32 %v169_v18 }
  0x38   : > { %357 = vpow2.f32 %v179_v19 }
  0x39   : > { %359 = vpow2.f32 %v171_v20 }
  0x44   : > { %v356_v21 = vpop.eup %355 }
  0x45   : > { %v358_v22 = vpop.eup %357  ;;  %v173_v23 = vmul.f32 1.5819767, %v356_v21 }
  0x46   : > { %v360_v24 = vpop.eup %359  ;;  %v181_v25 = vsel %vm177_vm0, %v358_v22, 0.0 }
  0x47   : > { %v175_v26 = vsel %vm165_vm1, %v173_v23, 0.0  ;;  %v174_v27 = vmul.f32 1.5819767, %v360_v24 }
  0x48   : > { %v182_v28 = vmul.f32 %v181_v25, %v175_v26 }
  0x49   : > { %v176_v29 = vsel %vm166_vm2, %v174_v27, 0.0 }
  0x4a   : > { %v184_v30 = vadd.f32 -0.5819767, %v182_v28  ;;  %v183_v31 = vmul.f32 %v181_v25, %v176_v29 }
  0x4c   : > { %v186_v32 = vmax.f32 %v184_v30, 0.0  ;;  %v185_v33 = vadd.f32 -0.5819767, %v183_v31 }
  0x4e   : > { %189 = vst.msk [vmem:[%s146_s7] sm:$0xff] %vm188_vm3, %v186_v32  ;;  %v187_v34 = vmax.f32 %v185_v33, 0.0 }
  0x50   : > { %190 = vst.msk [vmem:[%s146_s7 + $0x8] sm:$0xff] %vm188_vm3, %v187_v34 }
  0x51   : > { %400 = shalt.err (!%p397_p1)
}
  0x52   : > { %s401_s26 = scalar_lea.hbm %s569_s21, 256  ;;  %s405_s29 = scalar_lea.hbm %s613_s2, 512 }
  0x53   : > { %p402_p2 = scmp.ne.s32.totalorder %s569_s21, %s401_s26  ;;  %p406_p7 = scmp.lt.s32.totalorder %s569_s21, %s613_s2 }
  0x54   : > { %p407_p8 = scmp.lt.s32.totalorder %s405_s29, %s401_s26 }
  0x55   : > { %p403_p3 = pnand %p402_p2, %p515_p5 }
  0x56   : > { %p408_p9 = por %p407_p8, %p406_p7 }
  0x57   : > { %p404_p4 = pneg %p403_p3 }
  0x59   : > { %p409_p10 = pnand %p408_p9, %p404_p4 }
  0x5b   : > { %412 = shalt.err (!%p409_p10)
}
  0x5c   : > { %s460_s4 = smov 128   ;;  %s461_s5 = smov 8  }
  0x5d   : > { %301 = dma.vmem_to_hbm [thread:$0]  (%p515_p5), %s564_s8, 256, %s569_s21, %s571_s22, %s460_s4, %s460_s4, %s461_s5  }
  0x5e PF: > { %p318_p11 = scmp.ge.s32.totalorder %s455_s12, 2  ;;  %s220_s6 = sand.u32 1, %s443_s9  }
  0x5f   : > { %s221_s7 = scalar_lea.sflag [#allocation3], %s220_s6 }
  0x60   : > { %p311_p12 = pnand %p318_p11, %p519_p6 }
  0x62   : > { %p312_p13 = pneg %p311_p12 }
  0x64   : > { %438 = dma.done.wait (%p312_p13), %s221_s7, 256  }
  0x65   : > { %440 = vsyncadd (%p312_p13), %s221_s7, 4294967040  ;;  %p14_p0 = scmp.ge.s32.totalorder %s502_s15, 4   ;;  %s618_s9 = smov %s447_s10 }
  0x66   : > { %s619_s10 = smov %s451_s11  ;;  %s620_s11 = smov %s513_s18 }
  0x67   : > { %s621_s12 = smov %s502_s15  ;;  %16 = sbr.rel (!%p14_p0) target bundleno = 5 (0x5), region = 70 }
  0x6c   :  { %226 = vsyncpa [#allocation3], 1 }
  0x6d   :  { %228 = vsyncpa [#allocation3 + $0x1], 1 }
  0x6e   :  { %229 = vsyncpa [#allocation4], 1 }
  0x6f   :  { %231 = vsyncpa [#allocation4 + $0x1], 1 }
  0x70   :  { %232 = vsyncpa [#allocation5], 1 }
  0x71   :  { %234 = vsyncpa [#allocation5 + $0x1], 1 }

</bundles_post_ra>
